<compile_context>
chip_gen: v6e
topology: v6e:2x2x1
jax: 0.10.0
libtpu: 0.0.40
codegen_flags: <defaults>
</compile_context>

<pallas_src>
import functools
import math

import jax
import jax.numpy as jnp
from jax.experimental import pallas as pl
from jax.experimental.pallas import tpu as pltpu


def _round_up(x, m):
    return ((x + m - 1) // m) * m


def _per_step_vmem_bytes(batch_tile, d, k, in_itemsize, out_itemsize):
    # BlockSpec double-buffers every operand: x tile, centers^T, ||c||^2, out tile.
    return 2 * (batch_tile * d * in_itemsize
                + d * k * 4
                + k * 4
                + batch_tile * k * out_itemsize)


def _vmem_budget_bytes():
    """Generation-aware (per-step tile budget, vmem_limit cap).

    v5e/v6e: 128 MiB VMEM per TensorCore -> allow large batch tiles.
    v7x:     64 MiB per TensorCore       -> conservative budget.
    Falls back to the conservative numbers if the hardware query is unavailable.
    """
    try:
        cap = int(pltpu.get_tpu_info().vmem_capacity_bytes)
    except Exception:
        cap = 64 * 1024 * 1024
    if cap >= 96 * 1024 * 1024:                       # v5e / v6e (128 MiB)
        return 80 * 1024 * 1024, 96 * 1024 * 1024
    return 24 * 1024 * 1024, 48 * 1024 * 1024         # v7x (64 MiB) or unknown


def _cluster_assign_kernel(x_ref, ct_ref, csq_ref, o_ref, *, inv_alpha, matmul_dtype):
    # x_ref:   [TB, D]  batch tile (input dtype; partial edge block allowed)
    # ct_ref:  [D, K]   centers, pre-transposed (matmul dtype)
    # csq_ref: [1, K]   precomputed ||c||^2 (f32)
    # o_ref:   [TB, K]  soft assignments (out dtype)
    x = x_ref[...]
    x32 = x.astype(jnp.float32)
    x_mm = x if jnp.dtype(matmul_dtype) == x.dtype else x.astype(matmul_dtype)

    # MXU: cross term x @ c^T with f32 accumulation.
    xc = jnp.dot(x_mm, ct_ref[...], preferred_element_type=jnp.float32)   # [TB, K]

    # Row squared norms in f32.
    x_sq = jnp.sum(x32 * x32, axis=-1, keepdims=True)                     # [TB, 1]

    # ||x||^2 + ||c||^2 - 2 x.c  (clamped: FP cancellation can give tiny negatives).
    norm_sq = jnp.maximum(x_sq + csq_ref[...] - 2.0 * xc, 0.0)            # [TB, K]

    # Student-t numerator: 1 / (1 + d^2 / alpha)  -> EUP approximate reciprocal.
    numer = pl.reciprocal(1.0 + norm_sq * inv_alpha, approx=True)         # [TB, K]

    # Exact normalization so each row sums to 1 to f32 precision.
    denom = jnp.sum(numer, axis=-1, keepdims=True)                        # [TB, 1]
    o_ref[...] = (numer / denom).astype(o_ref.dtype)


def clustering_layer_forward(batch, cluster_centers, alpha=1.0, *,
                             batch_tile=None, use_bf16_matmul=False,
                             out_dtype=jnp.float32):
    """Pallas implementation of ClusteringLayer.forward.

    batch:           [B, D] feature vectors
    cluster_centers: [K, D] cluster centers
    returns:         [B, K] soft assignments (rows sum to 1), dtype `out_dtype`
    """
    B, D = batch.shape
    K, Dc = cluster_centers.shape
    assert D == Dc, "embedding dimension mismatch"

    matmul_dtype = jnp.bfloat16 if use_bf16_matmul else jnp.float32
    in_itemsize = jnp.dtype(batch.dtype).itemsize
    out_itemsize = jnp.dtype(out_dtype).itemsize

    tile_budget, vmem_cap = _vmem_budget_bytes()

    # Batch tile: multiple of 8 (16 for packed bf16 rows), capped at 2048 rows and
    # at ceil(B/2) (keeps grid >= 2 so v7x megacore can split the batch), shrunk
    # to stay within the generation-aware VMEM budget.
    row_align = 16 if use_bf16_matmul else 8
    if batch_tile is None:
        batch_tile = min(2048, _round_up(pl.cdiv(B, 2), row_align))
        batch_tile = max(row_align, batch_tile)
        while (batch_tile > row_align and
               _per_step_vmem_bytes(batch_tile, D, K, in_itemsize, out_itemsize)
               > tile_budget):
            batch_tile = max(row_align, _round_up(batch_tile // 2, row_align))
    batch_tile = max(row_align, _round_up(int(batch_tile), row_align))

    # Raise the scoped VMEM limit only if the per-step footprint needs it,
    # with headroom bounded by the generation's physical VMEM.
    vmem_need = _per_step_vmem_bytes(batch_tile, D, K, in_itemsize, out_itemsize)
    vmem_limit = None
    if vmem_need > 14 * 1024 * 1024:
        vmem_limit = min(int(vmem_need * 3 // 2), vmem_cap)

    # Host-side preprocessing: tiny [K, D] center work only (no pass over x).
    c = cluster_centers.astype(jnp.float32)
    c_sq = jnp.sum(c * c, axis=1)[None, :]              # [1, K]  (f32)
    ct = c.T.astype(matmul_dtype)                       # [D, K]  pre-transposed

    kernel = functools.partial(
        _cluster_assign_kernel,
        inv_alpha=1.0 / float(alpha),
        matmul_dtype=matmul_dtype,
    )

    grid = (pl.cdiv(B, batch_tile),)

    out = pl.pallas_call(
        kernel,
        out_shape=jax.ShapeDtypeStruct((B, K), out_dtype),
        grid_spec=pltpu.PrefetchScalarGridSpec(
            num_scalar_prefetch=0,
            grid=grid,
            in_specs=[
                pl.BlockSpec((batch_tile, D), lambda i: (i, 0)),   # batch tile
                pl.BlockSpec((D, K), lambda i: (0, 0)),            # centers^T (constant)
                pl.BlockSpec((1, K), lambda i: (0, 0)),            # ||c||^2 (constant)
            ],
            out_specs=pl.BlockSpec((batch_tile, K), lambda i: (i, 0)),
        ),
        compiler_params=pltpu.CompilerParams(
            dimension_semantics=("parallel",),
            vmem_limit_bytes=vmem_limit,
        ),
        cost_estimate=pl.CostEstimate(
            flops=2 * B * K * D + 6 * B * K,
            transcendentals=B * K,
            bytes_accessed=(B * D * in_itemsize + D * K * 4 + K * 4
                            + B * K * out_itemsize),
        ),
    )(batch, ct, c_sq)

    return out


def init_cluster_centers(key, cluster_number, hidden_dimension):
    """Xavier-uniform init matching nn.init.xavier_uniform_ on [K, D]."""
    bound = math.sqrt(6.0 / (cluster_number + hidden_dimension))
    return jax.random.uniform(
        key, (cluster_number, hidden_dimension),
        minval=-bound, maxval=bound, dtype=jnp.float32)


def reference_forward(batch, cluster_centers, alpha=1.0):
    """Pure-JAX reference mirroring the PyTorch code exactly."""
    norm_sq = jnp.sum((batch[:, None, :] - cluster_centers[None, :, :]) ** 2, axis=2)
    numerator = 1.0 / (1.0 + norm_sq / alpha)
    return numerator / jnp.sum(numerator, axis=1, keepdims=True)


if __name__ == "__main__":
    key = jax.random.PRNGKey(0)
    k_x, k_c, k_x2 = jax.random.split(key, 3)

    # Small shapes consistent with the module: [batch, hidden] features, K clusters.
    B, D, K = 8, 32, 4
    alpha = 1.0

    x = jax.random.normal(k_x, (B, D), dtype=jnp.float32)
    centers = init_cluster_centers(k_c, K, D)

    out = jax.block_until_ready(clustering_layer_forward(x, centers, alpha))
    ref = reference_forward(x, centers, alpha)
    assert out.shape == (B, K)
    assert jnp.allclose(out, ref, atol=1e-2, rtol=1e-2), "mismatch vs reference (f32 path)"
    assert jnp.allclose(jnp.sum(out, axis=1), jnp.ones((B,)), atol=1e-4), "rows must sum to ~1"

    # Larger case: batch tiling with a partial edge block (no padding), explicit tile,
    # the bf16-MXU path, and a narrow (bf16) output.
    B2, D2, K2 = 300, 128, 10
    x2 = jax.random.normal(k_x2, (B2, D2), dtype=jnp.float32)
    centers2 = init_cluster_centers(k_c, K2, D2)
    ref2 = reference_forward(x2, centers2, alpha)

    out2 = jax.block_until_ready(
        clustering_layer_forward(x2, centers2, alpha, batch_tile=128))
    assert out2.shape == (B2, K2)
    assert jnp.allclose(out2, ref2, atol=1e-2, rtol=1e-2), "mismatch vs reference (tiled f32)"

    out2_bf16mm = jax.block_until_ready(
        clustering_layer_forward(x2, centers2, alpha, use_bf16_matmul=True))
    assert jnp.allclose(out2_bf16mm, ref2, atol=3e-2, rtol=3e-2), "mismatch vs reference (bf16 MXU)"

    out2_bf16out = jax.block_until_ready(
        clustering_layer_forward(x2, centers2, alpha, out_dtype=jnp.bfloat16))
    assert out2_bf16out.dtype == jnp.bfloat16
    assert jnp.allclose(out2_bf16out.astype(jnp.float32), ref2, atol=2e-2, rtol=2e-2), \
        "mismatch vs reference (bf16 output)"

    print("KERNEL_OK")
</pallas_src>

<mosaic_0001>
module attributes {stable_mosaic.version = 11 : i64} {
  func.func @_cluster_assign_kernel(%arg0: i32, %arg1: memref<8x32xf32, #tpu.memory_space<vmem>>, %arg2: memref<32x4xf32, #tpu.memory_space<vmem>>, %arg3: memref<1x4xf32, #tpu.memory_space<vmem>>, %arg4: memref<8x4xf32, #tpu.memory_space<vmem>>) attributes {dimension_semantics = [#tpu.dimension_semantics<parallel>], iteration_bounds = array<i64: 1>, scalar_prefetch = 0 : i64, scratch_operands = 0 : i64, tpu.core_type = #tpu.core_type<tc>, window_params = [{transform_indices = @transform_0, window_bounds = array<i64: 8, 32>}, {pipeline_mode = #tpu.pipeline_mode<synchronous>, transform_indices = @transform_1, window_bounds = array<i64: 32, 4>}, {pipeline_mode = #tpu.pipeline_mode<synchronous>, transform_indices = @transform_2, window_bounds = array<i64: 1, 4>}, {transform_indices = @transform_3, window_bounds = array<i64: 8, 4>}]} {
    %c0 = arith.constant 0 : index
    %c0_0 = arith.constant 0 : index
    %0 = vector.load %arg1[%c0, %c0_0] : memref<8x32xf32, #tpu.memory_space<vmem>>, vector<8x32xf32>
    %c0_1 = arith.constant 0 : index
    %c0_2 = arith.constant 0 : index
    %1 = vector.load %arg2[%c0_1, %c0_2] : memref<32x4xf32, #tpu.memory_space<vmem>>, vector<32x4xf32>
    %cst = arith.constant dense<0.000000e+00> : vector<8x4xf32>
    %2 = tpu.matmul %0, %1, %cst {dimension_numbers = #tpu.dot_dimension_numbers<[1], [0], [0], [1], [0, 0, 1, 1], [], []>} : vector<8x32xf32>, vector<32x4xf32>, vector<8x4xf32> -> vector<8x4xf32>
    %3 = arith.mulf %0, %0 : vector<8x32xf32>
    %cst_3 = arith.constant dense<0.000000e+00> : vector<8xf32>
    %4 = vector.multi_reduction <add>, %3, %cst_3 [1] : vector<8x32xf32> to vector<8xf32>
    %5 = vector.shape_cast %4 : vector<8xf32> to vector<8x1xf32>
    %c0_4 = arith.constant 0 : index
    %c0_5 = arith.constant 0 : index
    %6 = vector.load %arg3[%c0_4, %c0_5] : memref<1x4xf32, #tpu.memory_space<vmem>>, vector<1x4xf32>
    %7 = vector.broadcast %5 : vector<8x1xf32> to vector<8x4xf32>
    %8 = vector.broadcast %6 : vector<1x4xf32> to vector<8x4xf32>
    %9 = arith.addf %7, %8 : vector<8x4xf32>
    %cst_6 = arith.constant 2.000000e+00 : f32
    %10 = vector.broadcast %cst_6 : f32 to vector<8x4xf32>
    %11 = arith.mulf %10, %2 : vector<8x4xf32>
    %12 = arith.subf %9, %11 : vector<8x4xf32>
    %cst_7 = arith.constant 0.000000e+00 : f32
    %13 = vector.broadcast %cst_7 : f32 to vector<8x4xf32>
    %14 = arith.maximumf %12, %13 : vector<8x4xf32>
    %cst_8 = arith.constant 1.000000e+00 : f32
    %15 = vector.broadcast %cst_8 : f32 to vector<8x4xf32>
    %16 = arith.mulf %14, %15 : vector<8x4xf32>
    %cst_9 = arith.constant 1.000000e+00 : f32
    %17 = vector.broadcast %cst_9 : f32 to vector<8x4xf32>
    %18 = arith.addf %17, %16 : vector<8x4xf32>
    %19 = tpu.reciprocal %18 {approx = true} : vector<8x4xf32> -> vector<8x4xf32>
    %cst_10 = arith.constant dense<0.000000e+00> : vector<8xf32>
    %20 = vector.multi_reduction <add>, %19, %cst_10 [1] : vector<8x4xf32> to vector<8xf32>
    %21 = vector.shape_cast %20 : vector<8xf32> to vector<8x1xf32>
    %22 = vector.broadcast %21 : vector<8x1xf32> to vector<8x4xf32>
    %23 = arith.divf %19, %22 : vector<8x4xf32>
    %c0_11 = arith.constant 0 : index
    %c0_12 = arith.constant 0 : index
    %24 = vector.load %arg4[%c0_11, %c0_12] : memref<8x4xf32, #tpu.memory_space<vmem>>, vector<8x4xf32>
    tpu.vector_store %arg4[%c0_11, %c0_12], %23 {strides = array<i32>} : memref<8x4xf32, #tpu.memory_space<vmem>>, vector<8x4xf32>,
    return
  }
  func.func @transform_0(%arg0: i32) -> (i32, i32) {
    %c0_i32 = arith.constant 0 : i32
    %c0_i32_0 = arith.constant 0 : i32
    return %arg0, %c0_i32 : i32, i32
  }
  func.func @transform_1(%arg0: i32) -> (i32, i32) {
    %c0_i32 = arith.constant 0 : i32
    %c0_i32_0 = arith.constant 0 : i32
    %c0_i32_1 = arith.constant 0 : i32
    return %c0_i32, %c0_i32_0 : i32, i32
  }
  func.func @transform_2(%arg0: i32) -> (i32, i32) {
    %c0_i32 = arith.constant 0 : i32
    %c0_i32_0 = arith.constant 0 : i32
    %c0_i32_1 = arith.constant 0 : i32
    return %c0_i32, %c0_i32_0 : i32, i32
  }
  func.func @transform_3(%arg0: i32) -> (i32, i32) {
    %c0_i32 = arith.constant 0 : i32
    %c0_i32_0 = arith.constant 0 : i32
    return %arg0, %c0_i32 : i32, i32
  }
}

</mosaic_0001>

<bundles_post_ra>
// kernel: tpu_custom_call.1
= control target key start
LH: loop header
LB: loop body
LE: loop exit
PB: predicated region body
PF: predicated region fallthrough
CT: control target
= control target key end

     0   :  { %v145_v0 = vmov 0.0   ;;  %vm146_vm0 = vmmov 0   ;;  %vm19_vm1 = vcmask 261120   ;;  %vm110_vm2 = vcmask 31744   ;;  %s188_s1 = inlined_call_operand.vmem [shape: f32[32,4], index: 1, kind: input, shape index: {}]   ;;  %s189_s0 = inlined_call_operand.vmem [shape: f32[8,32], index: 0, kind: input, shape index: {}]   ;;  %s190_s2 = inlined_call_operand.vmem [shape: f32[1,4], index: 2, kind: input, shape index: {}]   ;;  %s191_s3 = inlined_call_operand.vmem [shape: f32[8,4], index: 3, kind: output, shape index: {}]  }
   0x1   :  { %128 = vmatprep.subr.mxu0 %v145_v0  ;;  %v18_v1 = vld [vmem:[%s188_s1 + $0x18] sm:$0xff]  ;;  %v17_v2 = vld [vmem:[%s188_s1 + $0x10] sm:$0xff]  ;;  %136 = vmatprep.mubr.msk.f32.mxu0 %vm146_vm0, %v145_v0  ;;  %v14_v3 = vld [vmem:[%s189_s0] sm:$0xff] }
   0x2   :  { %129 = vmatpush3.msra.mxu0 %v18_v1  ;;  %v16_v4 = vld [vmem:[%s188_s1 + $0x8] sm:$0xff]  ;;  %v93_v5 = vmul.f32 %v14_v3, %v14_v3  ;;  %v15_v6 = vld [vmem:[%s188_s1] sm:$0xff] }
   0x3   :  { %130 = vmatprep.subr.mxu0 %v145_v0  ;;  %v122_v8 = vld [vmem:[%s190_s2] ss:$0 sm:$0xff] }
   0x4   :  { %131 = vmatpush3.msra.mxu0 %v17_v2  ;;  %v94_v7 = vsel %vm19_vm1, %v93_v5, 0.0 }
   0x5   :  { %132 = vmatprep.subr.mxu0 %v145_v0  ;;  %95 = vadd.xlane.f32.xlu0 %v94_v7 }
   0x6   :  { %133 = vmatpush3.msra.mxu0 %v16_v4 }
   0x7   :  { %134 = vmatprep.subr.mxu0 %v145_v0 }
   0x8   :  { %135 = vmatpush3.msra.mxu0 %v15_v6 }
   0x9   :  { %137 = vmatmul.mubr.msk.f32.vlgmr.msra.gmra.mxu0 %vm19_vm1, %v14_v3 }
  0x8e   :  { %v96_v9 = vpop.xlane.xlu0 %95 }
  0x8f   :  { %v104_v10 = vadd.f32 %v122_v8, %v96_v9 }
  0xc9   :  { %v89_v11 = vpop.f32.mrf.mxu0 }
  0xca   :  { %v105_v12 = vmul.f32 2.0, %v89_v11 }
  0xcb   :  { %v138_v13 = vpop.f32.mrf.mxu0 }
  0xcc   :  { %v106_v14 = vsub.f32 %v104_v10, %v105_v12 }
  0xce   :  { %v107_v15 = vmax.f32 %v106_v14, 0.0 }
  0xd0   :  { %v108_v16 = vadd.f32 1.0, %v107_v15 }
  0xd2   :  { %141 = vrcp.f32 %v108_v16 }
  0xdf   :  { %v142_v17 = vpop.eup %141 }
  0xe0   :  { %v111_v18 = vsel %vm110_vm2, %v142_v17, 0.0 }
  0xe1   :  { %112 = vadd.xlane.f32.xlu0 %v111_v18 }
 0x16a   :  { %v113_v19 = vpop.xlane.xlu0 %112 }
 0x16b   :  { %143 = vrcp.f32 %v113_v19 }
 0x178   :  { %v144_v20 = vpop.eup %143 }
 0x179   :  { %v115_v21 = vmul.f32 %v144_v20, %v142_v17 }
 0x17b   :  { %116 = vst.msk [vmem:[%s191_s3] sm:$0xff] %vm110_vm2, %v115_v21 }

</bundles_post_ra>
